<compile_context>
chip_gen: v6e
topology: v6e:2x2x1
jax: 0.10.0
libtpu: 0.0.40
codegen_flags: <defaults>
</compile_context>

<pallas_src>
import functools

import jax
import jax.numpy as jnp
from jax import lax
from jax.experimental import pallas as pl
from jax.experimental.pallas import tpu as pltpu


def make_divisible(v, divisor, min_value=None):
    # Standard EfficientNet helper (reproduced for parameter-shape derivation).
    if min_value is None:
        min_value = divisor
    new_v = max(min_value, int(v + divisor / 2) // divisor * divisor)
    if new_v < 0.9 * v:
        new_v += divisor
    return new_v


# ---------------------------------------------------------------------------
# Kernels
# ---------------------------------------------------------------------------
def _se_fused_kernel(x_ref, w1_ref, b1_ref, w2_ref, b2_ref, o_ref, *,
                     inv_hw, channels_last):
    """Fused pool + fc1/relu + fc2/sigmoid + residual add, one batch tile/step.

    channels_first: x_ref/o_ref are (B_tile, C, HW)   (HW on lanes)
    channels_last : x_ref/o_ref are (B_tile, HW, C)   (C on lanes)
    w1_ref: (C, Cr), b1_ref: (1, Cr), w2_ref: (Cr, C), b2_ref: (1, C)
    """
    spatial_axis = 1 if channels_last else 2
    # Global average pool accumulated in f32 WITHOUT a full-tile f32 temp.
    pooled = jnp.sum(x_ref[...], axis=spatial_axis, dtype=jnp.float32) * inv_hw  # (B, C)

    h = jnp.maximum(
        jnp.dot(pooled, w1_ref[...], preferred_element_type=jnp.float32)
        + b1_ref[...], 0.0)                                                       # (B, Cr)
    s = jax.nn.sigmoid(
        jnp.dot(h, w2_ref[...], preferred_element_type=jnp.float32)
        + b2_ref[...])                                                            # (B, C)
    s = s.astype(o_ref.dtype)

    # Residual ADD (per module spec), broadcast over the spatial axis.
    if channels_last:
        o_ref[...] = x_ref[...] + s[:, None, :]
    else:
        o_ref[...] = x_ref[...] + s[:, :, None]


def _pool_kernel(x_ref, pooled_ref, *, inv_hw, hw, hw_tile, channels_last):
    """Spatially-tiled global-average pool (fallback path).

    x_ref: (1, C, hw_tile) or (1, hw_tile, C) chunk of one sample.
    pooled_ref: full (N, C) f32 accumulator, resident across the whole grid.
    """
    n = pl.program_id(0)
    h = pl.program_id(1)
    spatial_axis = 1 if channels_last else 2

    # Mask spatial positions that overhang the last (partial) tile so padding
    # does not pollute the mean.
    idx = lax.broadcasted_iota(jnp.int32, x_ref.shape, spatial_axis)
    valid = (h * hw_tile + idx) < hw
    xblk = jnp.where(valid, x_ref[...], jnp.zeros((), x_ref.dtype))
    part = jnp.sum(xblk, axis=spatial_axis, dtype=jnp.float32)        # (1, C)

    row = pl.ds(n, 1)

    @pl.when(h == 0)
    def _():
        pooled_ref[row, :] = part

    @pl.when(h > 0)
    def _():
        pooled_ref[row, :] = pooled_ref[row, :] + part

    @pl.when(h == pl.num_programs(1) - 1)
    def _():
        pooled_ref[row, :] = pooled_ref[row, :] * inv_hw


def _excite_add_kernel(pooled_ref, w1_ref, b1_ref, w2_ref, b2_ref, x_ref, o_ref,
                       *, channels_last):
    """Streaming broadcast residual add (fallback path).

    The tiny (1,C)@(C,Cr)/(1,Cr)@(Cr,C) FC chain is recomputed per spatial
    tile; it is trivially hidden under the DMA of the x/o blocks.
    """
    n = pl.program_id(0)
    p = pooled_ref[pl.ds(n, 1), :]                                     # (1, C) f32
    hdn = jnp.maximum(
        jnp.dot(p, w1_ref[...], preferred_element_type=jnp.float32)
        + b1_ref[...], 0.0)
    s = jax.nn.sigmoid(
        jnp.dot(hdn, w2_ref[...], preferred_element_type=jnp.float32)
        + b2_ref[...])
    s = s.astype(o_ref.dtype)
    if channels_last:
        o_ref[...] = x_ref[...] + s[:, None, :]
    else:
        o_ref[...] = x_ref[...] + s[:, :, None]


# ---------------------------------------------------------------------------
# Wrapper
# ---------------------------------------------------------------------------
def _gen_budget(override):
    """Per-generation block-size / vmem-limit caps."""
    try:
        vmem_cap = int(getattr(pltpu.get_tpu_info(), "vmem_capacity_bytes", 64 << 20))
    except Exception:
        vmem_cap = 64 << 20                       # conservative (v7x-class)
    if vmem_cap >= (128 << 20):                   # v5e / v6e: 128 MiB physical VMEM
        max_block_bytes = 12 << 20
        vmem_limit_cap = 64 << 20
    else:                                         # v7x-class: 64 MiB per TensorCore
        max_block_bytes = 4 << 20
        vmem_limit_cap = 32 << 20
    if override is not None:
        max_block_bytes = int(override)
    return max_block_bytes, vmem_limit_cap


@functools.partial(jax.jit, static_argnames=("donate_x", "max_block_bytes_override"))
def squeeze_excitation(x_nchw, w1, b1, w2, b2, *, donate_x=False,
                       max_block_bytes_override=None):
    """x_nchw: (N, C, H, W). w1: (Cr, C), b1: (Cr,), w2: (C, Cr), b2: (C,)."""
    N, C, H, W = x_nchw.shape
    HW = H * W
    Cr = w1.shape[0]
    elem = jnp.dtype(x_nchw.dtype).itemsize

    max_block_bytes, vmem_limit_cap = _gen_budget(max_block_bytes_override)

    # Lane-dense layout: put a >=128-multiple axis on lanes whenever possible.
    channels_last = (HW % 128 != 0) and (C % 128 == 0)

    w1_t = w1.T.astype(jnp.float32)               # (C, Cr)
    w2_t = w2.T.astype(jnp.float32)               # (Cr, C)
    b1_row = b1.reshape(1, Cr).astype(jnp.float32)
    b2_row = b2.reshape(1, C).astype(jnp.float32)
    param_bytes = 4 * (C * Cr + Cr + Cr * C + C)

    x = x_nchw.reshape(N, C, HW)
    if channels_last:
        x = x.transpose(0, 2, 1)                  # (N, HW, C): channels on lanes

    per_sample_bytes = C * HW * elem
    inv_hw = 1.0 / HW

    def vmem_limit_for(block_bytes):
        # 2 pipeline buffers x (in + out) block + params + headroom, capped
        # per generation (never 48 MiB on v7x).
        need = 4 * block_bytes + 8 * param_bytes + (2 << 20)
        return int(min(vmem_limit_cap, max(8 << 20, need)))

    if per_sample_bytes <= max_block_bytes:
        # ---------------- main fused path: batch-tiled, single HBM pass -----
        MIN_STEPS = 4                              # >=4 grid steps when N allows
        steps_cap = max(1, N // MIN_STEPS)
        by_bytes = max(1, max_block_bytes // per_sample_bytes)
        B_tile = max(1, min(N, steps_cap, by_bytes))
        grid = (pl.cdiv(N, B_tile),)               # last block may be padded

        blk = (B_tile, HW, C) if channels_last else (B_tile, C, HW)
        out = pl.pallas_call(
            functools.partial(_se_fused_kernel, inv_hw=inv_hw,
                              channels_last=channels_last),
            out_shape=jax.ShapeDtypeStruct(x.shape, x.dtype),
            grid_spec=pltpu.PrefetchScalarGridSpec(
                num_scalar_prefetch=0,
                grid=grid,
                in_specs=[pl.BlockSpec(blk, lambda n: (n, 0, 0)),
                          pl.BlockSpec((C, Cr), lambda n: (0, 0)),
                          pl.BlockSpec((1, Cr), lambda n: (0, 0)),
                          pl.BlockSpec((Cr, C), lambda n: (0, 0)),
                          pl.BlockSpec((1, C), lambda n: (0, 0))],
                out_specs=pl.BlockSpec(blk, lambda n: (n, 0, 0))),
            compiler_params=pltpu.CompilerParams(
                dimension_semantics=("parallel",),
                vmem_limit_bytes=vmem_limit_for(B_tile * per_sample_bytes)),
            input_output_aliases=({0: 0} if donate_x else {}),
        )(x, w1_t, b1_row, w2_t, b2_row)
    else:
        # --------------- fallback: a single sample exceeds the block budget --
        # Tile the spatial axis: (1) tiled pool into a resident (N, C) f32
        # accumulator, (2) streaming excite+add over (sample, spatial-tile).
        if HW <= 128:
            hw_tile = HW
        else:
            hw_tile = max(128, (max_block_bytes // (C * elem)) // 128 * 128)
            hw_tile = min(hw_tile, HW)
        n_hw = pl.cdiv(HW, hw_tile)
        vlim = vmem_limit_for(C * hw_tile * elem)

        if channels_last:
            x_blk = (1, hw_tile, C)
            x_map = lambda n, h: (n, h, 0)
        else:
            x_blk = (1, C, hw_tile)
            x_map = lambda n, h: (n, 0, h)

        pooled = pl.pallas_call(
            functools.partial(_pool_kernel, inv_hw=inv_hw, hw=HW,
                              hw_tile=hw_tile, channels_last=channels_last),
            out_shape=jax.ShapeDtypeStruct((N, C), jnp.float32),
            grid_spec=pltpu.PrefetchScalarGridSpec(
                num_scalar_prefetch=0,
                grid=(N, n_hw),
                in_specs=[pl.BlockSpec(x_blk, x_map)],
                # (N, C) accumulator resident across the whole grid (constant
                # block index) -> keep both axes sequential.
                out_specs=pl.BlockSpec((N, C), lambda n, h: (0, 0))),
            compiler_params=pltpu.CompilerParams(
                dimension_semantics=("arbitrary", "arbitrary"),
                vmem_limit_bytes=vlim),
        )(x)

        out = pl.pallas_call(
            functools.partial(_excite_add_kernel, channels_last=channels_last),
            out_shape=jax.ShapeDtypeStruct(x.shape, x.dtype),
            grid_spec=pltpu.PrefetchScalarGridSpec(
                num_scalar_prefetch=0,
                grid=(N, n_hw),
                in_specs=[pl.BlockSpec((N, C), lambda n, h: (0, 0)),
                          pl.BlockSpec((C, Cr), lambda n, h: (0, 0)),
                          pl.BlockSpec((1, Cr), lambda n, h: (0, 0)),
                          pl.BlockSpec((Cr, C), lambda n, h: (0, 0)),
                          pl.BlockSpec((1, C), lambda n, h: (0, 0)),
                          pl.BlockSpec(x_blk, x_map)],
                out_specs=pl.BlockSpec(x_blk, x_map)),
            compiler_params=pltpu.CompilerParams(
                dimension_semantics=("parallel", "arbitrary"),
                vmem_limit_bytes=vlim),
            input_output_aliases=({5: 0} if donate_x else {}),
        )(pooled, w1_t, b1_row, w2_t, b2_row, x)

    if channels_last:
        out = out.transpose(0, 2, 1)
    return out.reshape(N, C, H, W)


# ---------------------------------------------------------------------------
# Reference + tests
# ---------------------------------------------------------------------------
def reference_se(x, w1, b1, w2, b2):
    # Pure-JAX mirror of the PyTorch forward (which ADDS the excitation).
    pooled = jnp.mean(x, axis=(2, 3), keepdims=True)                   # (N,C,1,1)
    h = jnp.maximum(jnp.einsum("rc,nchw->nrhw", w1, pooled)
                    + b1[None, :, None, None], 0.0)                    # (N,Cr,1,1)
    s = jax.nn.sigmoid(jnp.einsum("cr,nrhw->nchw", w2, h)
                       + b2[None, :, None, None])                      # (N,C,1,1)
    return s + x


def _make_case(key, n, c, h, w, cr):
    kx, kw1, kb1, kw2, kb2 = jax.random.split(key, 5)
    x = jax.random.normal(kx, (n, c, h, w), dtype=jnp.float32)
    w1 = jax.random.normal(kw1, (cr, c), dtype=jnp.float32) * 0.1      # fc1 1x1 conv
    b1 = jax.random.normal(kb1, (cr,), dtype=jnp.float32) * 0.1
    w2 = jax.random.normal(kw2, (c, cr), dtype=jnp.float32) * 0.1      # fc2 1x1 conv
    b2 = jax.random.normal(kb2, (c,), dtype=jnp.float32) * 0.1
    return x, w1, b1, w2, b2


if __name__ == "__main__":
    # Module hyperparameters (mirrors SqueezeExcitation.__init__ defaults).
    reduction, out_channels = 4, -1
    cr = make_divisible(max(out_channels, 8) // reduction, 8)          # -> 8

    key = jax.random.PRNGKey(0)
    k1, k2, k3, k4 = jax.random.split(key, 4)

    cases = [
        # (name, (x, w1, b1, w2, b2), max_block_bytes_override)
        ("fused / channels-first (HW %% 128 == 0)", _make_case(k1, 2,   4, 16, 16, cr), None),
        ("fused / channels-last  (C %% 128 == 0)",  _make_case(k2, 2, 128,  7,  7, cr), None),
        ("spatial-tiled fallback, channels-first",  _make_case(k3, 3,   8, 12, 12, cr), 4096),
        ("spatial-tiled fallback, channels-last",   _make_case(k4, 2, 128, 12, 12, cr), 65536),
    ]

    for name, (x, w1, b1, w2, b2), override in cases:
        out = squeeze_excitation(x, w1, b1, w2, b2,
                                 max_block_bytes_override=override)
        out = jax.block_until_ready(out)
        ref = reference_se(x, w1, b1, w2, b2)
        assert out.shape == x.shape, name
        assert jnp.allclose(out, ref, atol=1e-5, rtol=1e-5), \
            f"mismatch vs reference: {name}"

    print("KERNEL_OK")
</pallas_src>

<mosaic_0001>
module attributes {stable_mosaic.version = 11 : i64} {
  func.func @_se_fused_kernel(%arg0: i32, %arg1: memref<1x4x256xf32, #tpu.memory_space<vmem>>, %arg2: memref<4x8xf32, #tpu.memory_space<vmem>>, %arg3: memref<1x8xf32, #tpu.memory_space<vmem>>, %arg4: memref<8x4xf32, #tpu.memory_space<vmem>>, %arg5: memref<1x4xf32, #tpu.memory_space<vmem>>, %arg6: memref<1x4x256xf32, #tpu.memory_space<vmem>>) attributes {dimension_semantics = [#tpu.dimension_semantics<parallel>], iteration_bounds = array<i64: 2>, scalar_prefetch = 0 : i64, scratch_operands = 0 : i64, tpu.core_type = #tpu.core_type<tc>, window_params = [{transform_indices = @transform_0, window_bounds = array<i64: 1, 4, 256>}, {pipeline_mode = #tpu.pipeline_mode<synchronous>, transform_indices = @transform_1, window_bounds = array<i64: 4, 8>}, {pipeline_mode = #tpu.pipeline_mode<synchronous>, transform_indices = @transform_2, window_bounds = array<i64: 1, 8>}, {pipeline_mode = #tpu.pipeline_mode<synchronous>, transform_indices = @transform_3, window_bounds = array<i64: 8, 4>}, {pipeline_mode = #tpu.pipeline_mode<synchronous>, transform_indices = @transform_4, window_bounds = array<i64: 1, 4>}, {transform_indices = @transform_5, window_bounds = array<i64: 1, 4, 256>}]} {
    %c0 = arith.constant 0 : index
    %c0_0 = arith.constant 0 : index
    %c0_1 = arith.constant 0 : index
    %0 = vector.load %arg1[%c0, %c0_0, %c0_1] : memref<1x4x256xf32, #tpu.memory_space<vmem>>, vector<1x4x256xf32>
    %cst = arith.constant dense<0.000000e+00> : vector<1x4xf32>
    %1 = vector.multi_reduction <add>, %0, %cst [2] : vector<1x4x256xf32> to vector<1x4xf32>
    %cst_2 = arith.constant 3.906250e-03 : f32
    %2 = vector.broadcast %cst_2 : f32 to vector<1x4xf32>
    %3 = arith.mulf %1, %2 : vector<1x4xf32>
    %c0_3 = arith.constant 0 : index
    %c0_4 = arith.constant 0 : index
    %4 = vector.load %arg2[%c0_3, %c0_4] : memref<4x8xf32, #tpu.memory_space<vmem>>, vector<4x8xf32>
    %cst_5 = arith.constant dense<0.000000e+00> : vector<1x8xf32>
    %5 = tpu.matmul %3, %4, %cst_5 {dimension_numbers = #tpu.dot_dimension_numbers<[1], [0], [0], [1], [0, 0, 1, 1], [], []>} : vector<1x4xf32>, vector<4x8xf32>, vector<1x8xf32> -> vector<1x8xf32>
    %c0_6 = arith.constant 0 : index
    %c0_7 = arith.constant 0 : index
    %6 = vector.load %arg3[%c0_6, %c0_7] : memref<1x8xf32, #tpu.memory_space<vmem>>, vector<1x8xf32>
    %7 = arith.addf %5, %6 : vector<1x8xf32>
    %cst_8 = arith.constant 0.000000e+00 : f32
    %8 = vector.broadcast %cst_8 : f32 to vector<1x8xf32>
    %9 = arith.maximumf %7, %8 : vector<1x8xf32>
    %c0_9 = arith.constant 0 : index
    %c0_10 = arith.constant 0 : index
    %10 = vector.load %arg4[%c0_9, %c0_10] : memref<8x4xf32, #tpu.memory_space<vmem>>, vector<8x4xf32>
    %cst_11 = arith.constant dense<0.000000e+00> : vector<1x4xf32>
    %11 = tpu.matmul %9, %10, %cst_11 {dimension_numbers = #tpu.dot_dimension_numbers<[1], [0], [0], [1], [0, 0, 1, 1], [], []>} : vector<1x8xf32>, vector<8x4xf32>, vector<1x4xf32> -> vector<1x4xf32>
    %c0_12 = arith.constant 0 : index
    %c0_13 = arith.constant 0 : index
    %12 = vector.load %arg5[%c0_12, %c0_13] : memref<1x4xf32, #tpu.memory_space<vmem>>, vector<1x4xf32>
    %13 = arith.addf %11, %12 : vector<1x4xf32>
    %14 = arith.negf %13 : vector<1x4xf32>
    %15 = math.exp %14 : vector<1x4xf32>
    %cst_14 = arith.constant 1.000000e+00 : f32
    %16 = vector.broadcast %cst_14 : f32 to vector<1x4xf32>
    %17 = arith.addf %16, %15 : vector<1x4xf32>
    %18 = arith.divf %16, %17 : vector<1x4xf32>
    %c0_15 = arith.constant 0 : index
    %c0_16 = arith.constant 0 : index
    %c0_17 = arith.constant 0 : index
    %19 = vector.load %arg1[%c0_15, %c0_16, %c0_17] : memref<1x4x256xf32, #tpu.memory_space<vmem>>, vector<1x4x256xf32>
    %20 = vector.shape_cast %18 : vector<1x4xf32> to vector<1x4x1xf32>
    %21 = vector.broadcast %20 : vector<1x4x1xf32> to vector<1x4x256xf32>
    %22 = arith.addf %19, %21 : vector<1x4x256xf32>
    %c0_18 = arith.constant 0 : index
    %c0_19 = arith.constant 0 : index
    %c0_20 = arith.constant 0 : index
    %23 = vector.load %arg6[%c0_18, %c0_19, %c0_20] : memref<1x4x256xf32, #tpu.memory_space<vmem>>, vector<1x4x256xf32>
    tpu.vector_store %arg6[%c0_18, %c0_19, %c0_20], %22 {strides = array<i32>} : memref<1x4x256xf32, #tpu.memory_space<vmem>>, vector<1x4x256xf32>,
    return
  }
  func.func @transform_0(%arg0: i32) -> (i32, i32, i32) {
    %c0_i32 = arith.constant 0 : i32
    %c0_i32_0 = arith.constant 0 : i32
    %c0_i32_1 = arith.constant 0 : i32
    return %arg0, %c0_i32, %c0_i32_0 : i32, i32, i32
  }
  func.func @transform_1(%arg0: i32) -> (i32, i32) {
    %c0_i32 = arith.constant 0 : i32
    %c0_i32_0 = arith.constant 0 : i32
    %c0_i32_1 = arith.constant 0 : i32
    return %c0_i32, %c0_i32_0 : i32, i32
  }
  func.func @transform_2(%arg0: i32) -> (i32, i32) {
    %c0_i32 = arith.constant 0 : i32
    %c0_i32_0 = arith.constant 0 : i32
    %c0_i32_1 = arith.constant 0 : i32
    return %c0_i32, %c0_i32_0 : i32, i32
  }
  func.func @transform_3(%arg0: i32) -> (i32, i32) {
    %c0_i32 = arith.constant 0 : i32
    %c0_i32_0 = arith.constant 0 : i32
    %c0_i32_1 = arith.constant 0 : i32
    return %c0_i32, %c0_i32_0 : i32, i32
  }
  func.func @transform_4(%arg0: i32) -> (i32, i32) {
    %c0_i32 = arith.constant 0 : i32
    %c0_i32_0 = arith.constant 0 : i32
    %c0_i32_1 = arith.constant 0 : i32
    return %c0_i32, %c0_i32_0 : i32, i32
  }
  func.func @transform_5(%arg0: i32) -> (i32, i32, i32) {
    %c0_i32 = arith.constant 0 : i32
    %c0_i32_0 = arith.constant 0 : i32
    %c0_i32_1 = arith.constant 0 : i32
    return %arg0, %c0_i32, %c0_i32_0 : i32, i32, i32
  }
}

</mosaic_0001>

<bundles_post_ra>
// kernel: squeeze_excitation.1
= control target key start
LH: loop header
LB: loop body
LE: loop exit
PB: predicated region body
PF: predicated region fallthrough
CT: control target
= control target key end

     0   :  { %s565_s18 = smov 0   ;;  %s601_s0 = inlined_call_operand.vmem [shape: f32[2,4,256], index: 0, kind: input, shape index: {}]   ;;  %s602_s1 = inlined_call_operand.vmem [shape: f32[4,8], index: 1, kind: input, shape index: {}]   ;;  %s603_s2 = inlined_call_operand.vmem [shape: f32[1,8], index: 2, kind: input, shape index: {}]   ;;  %s604_s3 = inlined_call_operand.vmem [shape: f32[8,4], index: 3, kind: input, shape index: {}]   ;;  %s605_s4 = inlined_call_operand.vmem [shape: f32[1,4], index: 4, kind: input, shape index: {}]   ;;  %s606_s5 = inlined_call_operand.vmem [shape: f32[2,4,256], index: 5, kind: output, shape index: {}]  }
   0x1 LB: > { %s477_s19 = sadd.s32 4294967295, %s530_s18   ;;  %p481_p0 = scmp.ge.s32.totalorder %s530_s18, 1  ;;  %s530_s18 = sphi %s565_s18, %s15_s18  }
   0x2   : > { %p187_p1 = scmp.lt.s32.totalorder %s530_s18, 3 }
   0x4   : > { %p188_p2 = pnand %p481_p0, %p187_p1 }
   0x5   : > { %p215_p3 = scmp.lt.s32.totalorder (!%p188_p2), %s477_s19, 1 }
   0x6   : > { %191 = sbr.rel (%p188_p2) target bundleno = 708 (0x2c4), region = 40 }
   0xb   : > { %s608_s19 = smov (!%p215_p3, %s477_s19), 1  ;;  %vm229_vm0 = vcmask 1043456   ;;  %v532_v5 = vmov 0.0   ;;  %v236_v6 = vld [vmem:[%s602_s1] sm:$0xf]  ;;  %vm533_vm1 = vmmov 0   ;;  %v239_v7 = vlaneseq }
   0xc   : > { %s492_s20 = sshll.u32 %s608_s19, 3  ;;  %498 = vmatprep.subr.mxu0 %v532_v5  ;;  %503 = vmatprep.subr.mxu1 %v532_v5  ;;  %vm245_vm2 = vcmask 31744   ;;  %v322_v14 = vld [vmem:[%s604_s3] sm:$0xff]  ;;  %vm324_vm3 = vcmask 64512   ;;  %v534_v30 = vmov 839922192  }
   0xd   : > { %s219_s23 = scalar_lea.vmem %s601_s0, %s492_s20  ;;  %499 = vmatpush3.msk.msra.mxu0 %vm229_vm0, %v236_v6  ;;  %500 = vmatprep.mubr.msk.f32.mxu0 %vm533_vm1, %v532_v5  ;;  %v240_v8 = vand.u32 127, %v239_v7  ;;  %v242_v9 = vshrl.u32 %v239_v7, 7  ;;  %v237_v15 = vld [vmem:[%s603_s2] sm:$0x1]  ;;  %v413_v31 = vunpack.c.l.s4 %v534_v30  ;;  %s224_s9 = scalar_lea.vmem %s606_s5, %s492_s20 }
   0xe   : > { %v225_v0 = vld [vmem:[%s219_s23] sm:$0xff]  ;;  %505 = vmatprep.mubr.msk.f32.mxu1 %vm533_vm1, %v532_v5  ;;  %504 = vmatpush3.msra.mxu1 %v322_v14 }
   0xf   : > { %v227_v1 = vcombine.high %v225_v0, %v225_v0  ;;  %v230_v2 = vsel %vm229_vm0, %v225_v0, 0.0  ;;  %v243_v10 = vsub.s32 %v240_v8, %v242_v9  ;;  %v323_v20 = vld [vmem:[%s605_s4] sm:$0x1]  ;;  %v406_v27 = vsub.s32 0, %v242_v9 }
  0x10   : > { %v414_v32 = vunpack.c.0.s8 %v413_v31 }
  0x11   : > { %v231_v3 = vsel %vm229_vm0, %v227_v1, 0.0 }
  0x12   : > { %v232_v4 = vadd.f32 %v231_v3, %v230_v2  ;;  %v417_v33 = vsub.s32 %v414_v32, %v242_v9 }
  0x14   : > { %233 = vadd.xlane.f32.xlu0 %v232_v4 }
  0x9d   : > { %v234_v11 = vpop.xlane.xlu0 %233 }
  0x9e   : > { %v235_v12 = vmul.f32 0.00390625, %v234_v11 }
  0xa0   : > { %v244_v13 = vrot.slane %v235_v12, %v243_v10 }
  0xa2   : > { %501 = vmatmul.mubr.msk.f32.vlgmr.msra.gmra.mxu0 %vm245_vm2, %v244_v13 }
 0x162   : > { %v317_v16 = vpop.f32.mrf.mxu0 }
 0x163   : > { %v318_v17 = vadd.f32 %v317_v16, %v237_v15 }
 0x164   : > { %v502_v18 = vpop.f32.mrf.mxu0 }
 0x165   : > { %v321_v19 = vmax.f32 %v318_v17, 0.0 }
 0x167   : > { %506 = vmatmul.mubr.msk.f32.vlgmr.msra.gmra.mxu1 %vm324_vm3, %v321_v19 }
 0x227   : > { %v394_v21 = vpop.f32.mrf.mxu1 }
 0x228   : > { %v395_v22 = vadd.f32 %v394_v21, %v323_v20 }
 0x229   : > { %v507_v23 = vpop.f32.mrf.mxu1 }
 0x22a   : > { %v489_v24 = vmul.f32 -1.442695, %v395_v22 }
 0x22c   : > { %520 = vpow2.f32 %v489_v24 }
 0x239   : > { %v521_v25 = vpop.eup %520 }
 0x23a   : > { %v401_v26 = vadd.f32 1.0, %v521_v25 }
 0x23c   : > { %522 = vrcp.f32 %v401_v26 }
 0x249   : > { %v523_v28 = vpop.eup %522 }
 0x24a   : > { %v407_v29 = vrot.slane %v523_v28, %v406_v27 }
 0x24c   : > { %409 = vbcast.lane.b32.xlu0 %v407_v29, 256 }
 0x2be   : > { %v410_v34 = vpop.permute.xlu0 %409 }
 0x2bf   : > { %v418_v35 = vrot.slane %v410_v34, %v417_v33 }
 0x2c1   : > { %v420_v36 = vadd.f32 %v418_v35, %v225_v0 }
 0x2c3   : > { %421 = vst [vmem:[%s224_s9] sm:$0xff] %v420_v36 }
 0x2c4 PF: > { %s15_s18 = sadd.s32 1, %s530_s18  }
 0x2c5   : > { %p12_p4 = scmp.ge.s32.totalorder %s15_s18, 4  }
 0x2c7   :  { %14 = sbr.rel (!%p12_p4) target bundleno = 1 (0x1), region = 70 }

</bundles_post_ra>
